<compile_context>
chip_gen: v7x
topology: tpu7x:2x2x1
jax: 0.10.0
libtpu: 0.0.40
codegen_flags: <defaults>
</compile_context>

<pallas_src>
import jax
import jax.numpy as jnp
import numpy as np
from jax.experimental import pallas as pl
from jax.experimental.pallas import tpu as pltpu


def _make_kernel(k, pad, nb, l_out_pad):
    def kernel(x_ref, w_ref, b_ref, o_ref):
        # x_ref : (C_in, nb*L_out_pad) f32 — per-batch segments of width
        #         L_out_pad laid out as [ x[bi, :, :L_in] | zeros ].
        # w_ref : (K, C_out, C_in)  f32
        # b_ref : (C_out, 1)        f32
        # o_ref : (nb, C_out, L_out_pad) f32
        xw = x_ref[...]
        acc = None
        for kk in range(k):
            s = pad - kk  # right shift along lanes; always >= 0 for wide conv
            xs = xw if s == 0 else pltpu.roll(xw, s, axis=1)
            # Mask-free halo: within a segment lanes >= L_in are zero and
            # L_in + pad <= L_out_pad, so any lane the roll wraps in (previous
            # segment's tail / slab tail) is a zero lane, and any output lane
            # whose true value lies in the zero halo reads a zero. Hence the
            # rolled slab equals the zero-padded-and-shifted activation.
            t = jnp.dot(w_ref[kk], xs, preferred_element_type=jnp.float32)
            acc = t if acc is None else acc + t
        acc = acc + b_ref[...]  # bias once, f32 VPU epilogue
        # Aligned 128-multiple lane slices -> unmasked full-tile stores.
        # (nb is a small compile-time constant; static unroll is fine.)
        for bi in range(nb):
            o_ref[bi] = acc[:, bi * l_out_pad:(bi + 1) * l_out_pad]

    return kernel


def wide_conv1d(x, w, b, *, nb=None):
    """Conv1d(C_in, C_out, K, padding=2*(K//2)) on x: (N, C_in, L)."""
    n, c_in, l_in = x.shape
    c_out, c_in_w, k = w.shape
    assert c_in_w == c_in
    out_dtype = x.dtype

    pad = 2 * (k // 2)
    l_out = l_in + 2 * pad - k + 1
    l_out_pad = ((l_out + 127) // 128) * 128  # lane-dense output tile

    if nb is None:
        nb = n  # single fat step: 1 TensorCore chips (v5e/v6e) want max lanes
        if n % 2 == 0 and (n // 2) * l_out_pad >= 512:
            nb = n // 2  # two balanced steps for v7x's second TensorCore
    n_blocks = pl.cdiv(n, nb)
    n_pad = nb * n_blocks
    xb = x
    if n_pad != n:  # only reachable with a user-supplied non-divisor nb
        xb = jnp.pad(x, ((0, n_pad - n), (0, 0), (0, 0)))

    # Lane-dense activation slab (C_in, N*L_out_pad): batch folded into the
    # lane axis; per-segment trailing zeros double as the conv halo.  One
    # small fused transpose+pad op in the wrapper (the free reshape merges
    # contiguous dims) replaces the entire in-kernel im2col build.
    xw = jnp.pad(
        jnp.transpose(xb, (1, 0, 2)).astype(jnp.float32),
        ((0, 0), (0, 0), (0, l_out_pad - l_in)),
    ).reshape(c_in, n_pad * l_out_pad)
    w_t = jnp.transpose(w, (2, 0, 1)).astype(jnp.float32)  # (K, C_out, C_in)
    b2 = b.reshape(c_out, 1).astype(jnp.float32)

    # Explicit VMEM budget (double-buffered in/out blocks + tiny weight/bias
    # blocks), with headroom; capped well under v7x's 64 MiB physical VMEM.
    block_bytes = (
        2 * c_in * nb * l_out_pad * 4
        + 2 * nb * c_out * l_out_pad * 4
        + 2 * (k * c_out * c_in + c_out) * 4
    )
    vmem_limit = min(max(4 * block_bytes, 16 << 20), 48 << 20)

    out_padded = pl.pallas_call(
        _make_kernel(k, pad, nb, l_out_pad),
        out_shape=jax.ShapeDtypeStruct((n_pad, c_out, l_out_pad), jnp.float32),
        grid=(n_blocks,),
        in_specs=[
            pl.BlockSpec((c_in, nb * l_out_pad), lambda i: (0, i)),
            pl.BlockSpec((k, c_out, c_in), lambda i: (0, 0, 0)),
            pl.BlockSpec((c_out, 1), lambda i: (0, 0)),
        ],
        out_specs=pl.BlockSpec((nb, c_out, l_out_pad), lambda i: (i, 0, 0)),
        compiler_params=pltpu.CompilerParams(
            dimension_semantics=("parallel",),
            vmem_limit_bytes=vmem_limit,
        ),
    )(xw, w_t, b2)

    # Slice away lane padding (and any batch padding) -> exact PyTorch shape.
    return out_padded[:n, :, :l_out].astype(out_dtype)


if __name__ == "__main__":
    # Small shapes consistent with the module's forward.
    N, C_IN, C_OUT, L, K = 2, 4, 8, 16, 3
    PAD = 2 * (K // 2)

    key = jax.random.PRNGKey(0)
    kx, kw, kb = jax.random.split(key, 3)

    x = jax.random.normal(kx, (N, C_IN, L), dtype=jnp.float32)
    bound = 1.0 / np.sqrt(C_IN * K)
    w = jax.random.uniform(kw, (C_OUT, C_IN, K), minval=-bound, maxval=bound,
                           dtype=jnp.float32)
    b = jax.random.uniform(kb, (C_OUT,), minval=-bound, maxval=bound,
                           dtype=jnp.float32)

    out = jax.block_until_ready(wide_conv1d(x, w, b))
    l_out = L + 2 * PAD - K + 1
    assert out.shape == (N, C_OUT, l_out), out.shape

    # Pure-numpy float64 reference conv; tolerance covers whatever internal
    # precision the MXU uses for the in-kernel f32 matmuls.
    x_np = np.asarray(x, dtype=np.float64)
    w_np = np.asarray(w, dtype=np.float64)
    b_np = np.asarray(b, dtype=np.float64)
    x_p = np.pad(x_np, ((0, 0), (0, 0), (PAD, PAD)))
    ref = np.zeros((N, C_OUT, l_out))
    for kk in range(K):
        ref += np.einsum("oc,ncl->nol", w_np[:, :, kk],
                         x_p[:, :, kk:kk + l_out])
    ref += b_np.reshape(1, C_OUT, 1)
    np.testing.assert_allclose(np.asarray(out), ref, rtol=2e-2, atol=2e-2)

    print("KERNEL_OK")
</pallas_src>

<mosaic_0001>
module attributes {stable_mosaic.version = 11 : i64} {
  func.func @kernel(%arg0: i32, %arg1: memref<4x256xf32, #tpu.memory_space<vmem>>, %arg2: memref<3x8x4xf32, #tpu.memory_space<vmem>>, %arg3: memref<8x1xf32, #tpu.memory_space<vmem>>, %arg4: memref<2x8x128xf32, #tpu.memory_space<vmem>>) attributes {dimension_semantics = [#tpu.dimension_semantics<parallel>], iteration_bounds = array<i64: 1>, scalar_prefetch = 0 : i64, scratch_operands = 0 : i64, tpu.core_type = #tpu.core_type<tc>, window_params = [{transform_indices = @transform_0, window_bounds = array<i64: 4, 256>}, {pipeline_mode = #tpu.pipeline_mode<synchronous>, transform_indices = @transform_1, window_bounds = array<i64: 3, 8, 4>}, {pipeline_mode = #tpu.pipeline_mode<synchronous>, transform_indices = @transform_2, window_bounds = array<i64: 8, 1>}, {transform_indices = @transform_3, window_bounds = array<i64: 2, 8, 128>}]} {
    %c0 = arith.constant 0 : index
    %c0_0 = arith.constant 0 : index
    %0 = vector.load %arg1[%c0, %c0_0] : memref<4x256xf32, #tpu.memory_space<vmem>>, vector<4x256xf32>
    %c2_i32 = arith.constant 2 : i32
    %1 = tpu.dynamic_rotate %0 by %c2_i32 dim 1 : vector<4x256xf32>, i32 -> vector<4x256xf32>
    %c0_1 = arith.constant 0 : index
    %c0_2 = arith.constant 0 : index
    %c0_3 = arith.constant 0 : index
    %2 = vector.load %arg2[%c0_1, %c0_2, %c0_3] : memref<3x8x4xf32, #tpu.memory_space<vmem>>, vector<1x8x4xf32>
    %3 = vector.shape_cast %2 : vector<1x8x4xf32> to vector<8x4xf32>
    %cst = arith.constant dense<0.000000e+00> : vector<8x256xf32>
    %4 = tpu.matmul %3, %1, %cst {dimension_numbers = #tpu.dot_dimension_numbers<[1], [0], [0], [1], [0, 0, 1, 1], [], []>} : vector<8x4xf32>, vector<4x256xf32>, vector<8x256xf32> -> vector<8x256xf32>
    %c1_i32 = arith.constant 1 : i32
    %5 = tpu.dynamic_rotate %0 by %c1_i32 dim 1 : vector<4x256xf32>, i32 -> vector<4x256xf32>
    %c1 = arith.constant 1 : index
    %c0_4 = arith.constant 0 : index
    %c0_5 = arith.constant 0 : index
    %6 = vector.load %arg2[%c1, %c0_4, %c0_5] : memref<3x8x4xf32, #tpu.memory_space<vmem>>, vector<1x8x4xf32>
    %7 = vector.shape_cast %6 : vector<1x8x4xf32> to vector<8x4xf32>
    %cst_6 = arith.constant dense<0.000000e+00> : vector<8x256xf32>
    %8 = tpu.matmul %7, %5, %cst_6 {dimension_numbers = #tpu.dot_dimension_numbers<[1], [0], [0], [1], [0, 0, 1, 1], [], []>} : vector<8x4xf32>, vector<4x256xf32>, vector<8x256xf32> -> vector<8x256xf32>
    %9 = arith.addf %4, %8 : vector<8x256xf32>
    %c2 = arith.constant 2 : index
    %c0_7 = arith.constant 0 : index
    %c0_8 = arith.constant 0 : index
    %10 = vector.load %arg2[%c2, %c0_7, %c0_8] : memref<3x8x4xf32, #tpu.memory_space<vmem>>, vector<1x8x4xf32>
    %11 = vector.shape_cast %10 : vector<1x8x4xf32> to vector<8x4xf32>
    %cst_9 = arith.constant dense<0.000000e+00> : vector<8x256xf32>
    %12 = tpu.matmul %11, %0, %cst_9 {dimension_numbers = #tpu.dot_dimension_numbers<[1], [0], [0], [1], [0, 0, 1, 1], [], []>} : vector<8x4xf32>, vector<4x256xf32>, vector<8x256xf32> -> vector<8x256xf32>
    %13 = arith.addf %9, %12 : vector<8x256xf32>
    %c0_10 = arith.constant 0 : index
    %c0_11 = arith.constant 0 : index
    %14 = vector.load %arg3[%c0_10, %c0_11] : memref<8x1xf32, #tpu.memory_space<vmem>>, vector<8x1xf32>
    %15 = vector.broadcast %14 : vector<8x1xf32> to vector<8x256xf32>
    %16 = arith.addf %13, %15 : vector<8x256xf32>
    %17 = vector.extract_strided_slice %16 {offsets = [0, 0], sizes = [8, 128], strides = [1, 1]} : vector<8x256xf32> to vector<8x128xf32>
    %c0_12 = arith.constant 0 : index
    %c0_13 = arith.constant 0 : index
    %c0_14 = arith.constant 0 : index
    %18 = vector.load %arg4[%c0_12, %c0_13, %c0_14] : memref<2x8x128xf32, #tpu.memory_space<vmem>>, vector<1x8x128xf32>
    %19 = vector.shape_cast %18 : vector<1x8x128xf32> to vector<8x128xf32>
    %20 = vector.shape_cast %17 : vector<8x128xf32> to vector<1x8x128xf32>
    tpu.vector_store %arg4[%c0_12, %c0_13, %c0_14], %20 {strides = array<i32>} : memref<2x8x128xf32, #tpu.memory_space<vmem>>, vector<1x8x128xf32>,
    %21 = vector.extract_strided_slice %16 {offsets = [0, 128], sizes = [8, 128], strides = [1, 1]} : vector<8x256xf32> to vector<8x128xf32>
    %c1_15 = arith.constant 1 : index
    %c0_16 = arith.constant 0 : index
    %c0_17 = arith.constant 0 : index
    %22 = vector.load %arg4[%c1_15, %c0_16, %c0_17] : memref<2x8x128xf32, #tpu.memory_space<vmem>>, vector<1x8x128xf32>
    %23 = vector.shape_cast %22 : vector<1x8x128xf32> to vector<8x128xf32>
    %24 = vector.shape_cast %21 : vector<8x128xf32> to vector<1x8x128xf32>
    tpu.vector_store %arg4[%c1_15, %c0_16, %c0_17], %24 {strides = array<i32>} : memref<2x8x128xf32, #tpu.memory_space<vmem>>, vector<1x8x128xf32>,
    return
  }
  func.func @transform_0(%arg0: i32) -> (i32, i32) {
    %c0_i32 = arith.constant 0 : i32
    %c0_i32_0 = arith.constant 0 : i32
    return %c0_i32, %arg0 : i32, i32
  }
  func.func @transform_1(%arg0: i32) -> (i32, i32, i32) {
    %c0_i32 = arith.constant 0 : i32
    %c0_i32_0 = arith.constant 0 : i32
    %c0_i32_1 = arith.constant 0 : i32
    %c0_i32_2 = arith.constant 0 : i32
    return %c0_i32, %c0_i32_0, %c0_i32_1 : i32, i32, i32
  }
  func.func @transform_2(%arg0: i32) -> (i32, i32) {
    %c0_i32 = arith.constant 0 : i32
    %c0_i32_0 = arith.constant 0 : i32
    %c0_i32_1 = arith.constant 0 : i32
    return %c0_i32, %c0_i32_0 : i32, i32
  }
  func.func @transform_3(%arg0: i32) -> (i32, i32, i32) {
    %c0_i32 = arith.constant 0 : i32
    %c0_i32_0 = arith.constant 0 : i32
    %c0_i32_1 = arith.constant 0 : i32
    return %arg0, %c0_i32, %c0_i32_0 : i32, i32, i32
  }
}

</mosaic_0001>

<bundles_post_ra>
// kernel: tpu_custom_call.1
= control target key start
LH: loop header
LB: loop body
LE: loop exit
PB: predicated region body
PF: predicated region fallthrough
CT: control target
= control target key end

     0   :  { %s357_s14 = smov 2   ;;  %s358_s15 = smov 1   ;;  %v359_v2 = vmov 0.0   ;;  %s420_s0 = inlined_call_operand.vmem [shape: f32[4,256], index: 0, kind: input, shape index: {}]   ;;  %s421_s1 = inlined_call_operand.vmem [shape: f32[3,8,4], index: 1, kind: input, shape index: {}]   ;;  %s422_s2 = inlined_call_operand.vmem [shape: f32[8,1], index: 2, kind: input, shape index: {}]   ;;  %s423_s3 = inlined_call_operand.hbm [shape: f32[2,8,128], index: 3, kind: output, shape index: {}]  }
   0x1   :  { %v15_v0 = vld [vmem:[%s420_s0] sm:$0xff]  ;;  %193 = vmatprep.mubr.f32.mxu0 %v359_v2  ;;  %113 = vmatprep.mubr.f32.mxu1 %v359_v2 }
   0x2   :  { %19 = vrot.lane.b32.xlu0 %v15_v0, %s357_s14  ;;  %29 = vrot.lane.b32.xlu1 %v15_v0, %s358_s15  ;;  %v17_v1 = vcombine.high %v15_v0, %v15_v0 }
   0x3   :  { %8 = vsyncpa [#allocation3], 0  ;;  %v360_v3 = vmov 0   ;;  %v282_v4 = vld [vmem:[%s422_s2] sm:$0xff]  ;;  %v23_v5 = vlaneseq  ;;  %vm42_vm2 = vcmask 1043456   ;;  %vm38_vm3 = vcmask 31744  }
   0x4   :  { %331 = vset.pattern.permute.xlu0 %v360_v3  ;;  %v28_v13 = vld [vmem:[%s421_s1] sm:$0xff]  ;;  %v309_v16 = vld [vmem:[%s421_s1 + $0x8] sm:$0xff]  ;;  %v316_v17 = vld [vmem:[%s421_s1 + $0x10] sm:$0xff]  ;;  %s361_s22 = smov [#allocation2]  }
   0x5   :  { %v24_v6 = vand.u32 127, %v23_v5  ;;  %s298_s23 = sshll.u32 %s361_s22, 4  ;;  %s299_s23 = int_to_ptr.vmem [resolvable:$true] %s298_s23 }
   0x6   :  { %21 = vrot.lane.b32.xlu0 %v17_v1, %s357_s14  ;;  %31 = vrot.lane.b32.xlu1 %v17_v1, %s358_s15  ;;  %s333_s24 = scalar_lea.vmem %s299_s23, 256  ;;  %p338_p1 = scmp.lt.s32.totalorder %s299_s23, %s299_s23 }
   0x7   :  { %vm25_vm0 = vcmp.lt.s32.totalorder %v24_v6, 2  ;;  %vm33_vm1 = vcmp.lt.s32.totalorder %v24_v6, 1  ;;  %p334_p0 = scmp.ne.s32.totalorder %s299_s23, %s333_s24  ;;  %p339_p2 = scmp.lt.s32.totalorder %s333_s24, %s333_s24 }
   0x9   :  { %p340_p3 = por %p339_p2, %p338_p1 }
   0xa   :  { %285 = vperm.xlu0 %331, %v282_v4  }
   0xb   :  { %p341_p4 = pnand %p340_p3, %p334_p0 }
  0x74   :  { %v20_v7 = vpop.permute.xlu0 %19  ;;  %v30_v8 = vpop.permute.xlu1 %29 }
  0x78   :  { %v22_v9 = vpop.permute.xlu0 %21  ;;  %v32_v10 = vpop.permute.xlu1 %31 }
  0x79   :  { %v26_v11 = vsel %vm25_vm0, %v20_v7, %v22_v9  ;;  %v27_v12 = vsel %vm25_vm0, %v22_v9, %v20_v7  ;;  %v34_v14 = vsel %vm33_vm1, %v30_v8, %v32_v10  ;;  %v35_v15 = vsel %vm33_vm1, %v32_v10, %v30_v8 }
  0x7a   :  { %313 = vmatprep.subr.msk.mxu0 %vm42_vm2, %v26_v11  ;;  %310 = vmatprep.subr.msk.mxu1 %vm42_vm2, %v34_v14 }
  0x7b   :  { %314 = vmatpush1.msk.msra.mxu0 %vm42_vm2, %v27_v12  ;;  %311 = vmatpush1.msk.msra.mxu1 %vm42_vm2, %v35_v15 }
  0x7c   :  { %315 = vmatmul.mubr.msk.f32.vlgmr.msra.gmra.mrb[0].mxu0 %vm38_vm3, %v28_v13  ;;  %317 = vmatprep.subr.msk.mxu0 %vm42_vm2, %v17_v1 }
  0x7d   :  { %318 = vmatpush1.msk.msra.mxu0 %vm42_vm2, %v15_v0  ;;  %273 = vmatprep.mubr.f32.mxu0 %v359_v2 }
  0x7e   :  { %312 = vmatmul.mubr.msk.f32.vlgmr.msra.gmra.mrb[0].mxu1 %vm38_vm3, %v309_v16 }
  0x84   :  { %319 = vmatmul.mubr.msk.f32.vlgmr.msra.gmra.mrb[0].mxu0 %vm38_vm3, %v316_v17 }
  0x89   :  { %v286_v21 = vpop.permute.xlu0 %285 }
 0x151   :  { %v115_v18 = vpop.f32.mrb[0].mxu1 }
 0x152   :  { %v117_v19 = vpop.f32.mrb[1].mxu1 }
 0x157   :  { %v275_v20 = vpop.f32.mrb[0].mxu0 }
 0x158   :  { %v320_v22 = vadd.f32 %v275_v20, %v115_v18  ;;  %v277_v23 = vpop.f32.mrb[1].mxu0 }
 0x159   :  { %v321_v24 = vadd.f32 %v277_v23, %v117_v19 }
 0x15a   :  { %v288_v25 = vadd.f32 %v320_v22, %v286_v21 }
 0x15b   :  { %v289_v26 = vadd.f32 %v321_v24, %v286_v21 }
 0x15c   :  { %290 = vst [vmem:[#allocation2] sm:$0xff] %v288_v25 }
 0x15d   :  { %292 = vst [vmem:[#allocation2 + $0x8] sm:$0xff] %v289_v26 }
 0x15e   :  { %344 = shalt.err (!%p341_p4)
}
 0x15f   :  { %s345_s26 = scalar_lea.hbm %s423_s3, 256 }
 0x160   :  { %p346_p5 = scmp.ne.s32.totalorder %s423_s3, %s345_s26  ;;  %p349_p6 = scmp.lt.u32.totalorder %s345_s26, %s423_s3 }
 0x162   :  { %p351_p7 = pnand %p349_p6, %p346_p5 }
 0x164   :  { %354 = shalt.err (!%p351_p7)
}
 0x165   :  { %s362_s4 = smov 128   ;;  %s363_s5 = smov 8  }
 0x166   :  { %304 = dma.vmem_to_hbm [thread:$0]  %s299_s23, 256, %s423_s3, [#allocation3], %s362_s4, %s362_s4, %s363_s5  }
 0x167   :  { %355 = dma.done.wait [#allocation3], 256  }
 0x168   :  { %356 = vsyncadd [#allocation3], 4294967040 }
 0x169   :  { %308 = vsyncpa [#allocation3], 1 }

</bundles_post_ra>
